<compile_context>
chip_gen: v7x
topology: tpu7x:2x2x1
jax: 0.10.0
libtpu: 0.0.40
codegen_flags: <defaults>
</compile_context>

<pallas_src>
import functools

import jax
import jax.numpy as jnp
from jax.experimental import pallas as pl
from jax.experimental.pallas import tpu as pltpu

_LANE = 128
# Below this many output bytes, a plain XLA contiguous-prefix slice beats the
# pallas_call fixed cost (kernel launch + DMA descriptor setup).
_XLA_FAST_PATH_BYTES = 256 * 1024
# Above this many output bytes, split into a few concurrent DMAs.
_MULTI_DMA_BYTES = 1 * 1024 * 1024
_MAX_DMA_CHUNKS = 4


def _row_chunks(rows, nchunks):
    """Static (start, size) row partitions covering [0, rows)."""
    nchunks = max(1, min(nchunks, rows))
    base, rem = divmod(rows, nchunks)
    chunks, start = [], 0
    for c in range(nchunks):
        size = base + (1 if c < rem else 0)
        chunks.append((start, size))
        start += size
    return tuple(chunks)


def _make_dma_copy_kernel(chunks):
    """HBM->HBM copy of the table prefix; never touches VMEM or vregs."""

    def kernel(src_ref, out_ref, sems):
        copies = []
        for c, (start, size) in enumerate(chunks):
            cp = pltpu.make_async_copy(
                src_ref.at[pl.ds(start, size), :],
                out_ref.at[pl.ds(start, size), :],
                sems.at[c],
            )
            cp.start()
            copies.append(cp)
        # All chunks are in flight before the first wait -> concurrent DMAs.
        for cp in copies:
            cp.wait()

    return kernel


@functools.partial(jax.jit, static_argnames=("seq_len", "force_pallas"))
def learnable_positional_embedding(weight, seq_len, *, force_pallas=False):
    """Pallas equivalent of LearnablePositionalEmbedding.forward.

    weight:  (1, max_len, d_model) learnable table.
    returns: (1, seq_len, d_model) == weight[:, :seq_len, :]
    """
    one, max_len, d_model = weight.shape
    assert one == 1
    assert 0 < seq_len <= max_len
    dtype = weight.dtype
    itemsize = jnp.dtype(dtype).itemsize

    total = seq_len * d_model
    table_total = max_len * d_model
    out_bytes = total * itemsize

    # ---- Fast path: tiny tables -> single XLA slice, no kernel launch ----
    if out_bytes <= _XLA_FAST_PATH_BYTES and not force_pallas:
        return weight[:, :seq_len, :]

    # ---- 2-D presentation of the contiguous prefix ----
    # DMA correctness never depends on lane width; we just prefer wide rows so
    # each chunk is one fat contiguous span.  All reshapes here are free
    # bitcasts of a contiguous array.
    w2d = weight.reshape(max_len, d_model)
    if d_model % _LANE == 0:
        src, rows, cols = w2d, seq_len, d_model
    else:
        cols = None
        for cand in (2048, 1024, 512, 256, _LANE):
            if total % cand == 0 and table_total % cand == 0:
                cols = cand
                break
        if cols is not None:
            src = w2d.reshape(table_total // cols, cols)
            rows = total // cols
        else:
            # Prefix not 128-divisible: keep the natural view. Each row is
            # still contiguous and adjacent, so the DMA remains dense.
            src, rows, cols = w2d, seq_len, d_model

    nchunks = _MAX_DMA_CHUNKS if out_bytes >= _MULTI_DMA_BYTES else 1
    chunks = _row_chunks(rows, nchunks)

    # TODO(synk): on v7x a pl.core_map over both TensorCores could split DMA
    # issue across cores; a single core issuing a few concurrent DMAs is
    # already HBM-bandwidth-bound, so this is left out.
    out2d = pl.pallas_call(
        _make_dma_copy_kernel(chunks),
        out_shape=jax.ShapeDtypeStruct((rows, cols), dtype),
        in_specs=[pl.BlockSpec(memory_space=pl.ANY)],
        out_specs=pl.BlockSpec(memory_space=pl.ANY),
        scratch_shapes=[pltpu.SemaphoreType.DMA((len(chunks),))],
    )(src)

    # Free reshape back to the module's (1, seq_len, d_model) output shape.
    return out2d.reshape(1, seq_len, d_model)


if __name__ == "__main__":
    key = jax.random.PRNGKey(0)
    k1, k2, k3, k4, kx = jax.random.split(key, 5)

    # --- Case 1: module-like small shapes (d_model < 128 -> flattened view) ---
    d_model, max_len, batch, seq = 32, 64, 2, 8
    weight = 0.1 * jax.random.normal(k1, (1, max_len, d_model), dtype=jnp.float32)
    x = jax.random.normal(kx, (batch, seq, d_model), dtype=jnp.float32)
    out = jax.block_until_ready(
        learnable_positional_embedding(weight, seq_len=x.shape[1], force_pallas=True)
    )
    assert out.shape == (1, seq, d_model)
    assert bool(jnp.array_equal(out, weight[:, :seq, :]))

    # --- Case 2: lane-aligned d_model, seq_len not a multiple of 8 ---
    d_model2, max_len2, seq2 = 128, 512, 5
    weight2 = 0.1 * jax.random.normal(k2, (1, max_len2, d_model2), dtype=jnp.float32)
    out2 = jax.block_until_ready(
        learnable_positional_embedding(weight2, seq_len=seq2, force_pallas=True)
    )
    assert out2.shape == (1, seq2, d_model2)
    assert bool(jnp.array_equal(out2, weight2[:, :seq2, :]))

    # --- Case 3: awkward d_model (natural-view DMA path, still exact) ---
    d_model3, max_len3, seq3 = 40, 64, 8
    weight3 = 0.1 * jax.random.normal(k3, (1, max_len3, d_model3), dtype=jnp.float32)
    out3 = jax.block_until_ready(
        learnable_positional_embedding(weight3, seq_len=seq3, force_pallas=True)
    )
    assert out3.shape == (1, seq3, d_model3)
    assert bool(jnp.array_equal(out3, weight3[:, :seq3, :]))

    # --- Case 4: 1 MiB prefix -> default path uses Pallas with 4 concurrent DMAs ---
    d_model4, max_len4, seq4 = 256, 1024, 1024
    weight4 = 0.1 * jax.random.normal(k4, (1, max_len4, d_model4), dtype=jnp.float32)
    out4 = jax.block_until_ready(
        learnable_positional_embedding(weight4, seq_len=seq4)
    )
    assert out4.shape == (1, seq4, d_model4)
    assert bool(jnp.array_equal(out4, weight4[:, :seq4, :]))

    # --- Case 5: tiny table on the XLA fast path (no kernel launch) ---
    out5 = jax.block_until_ready(
        learnable_positional_embedding(weight, seq_len=seq)
    )
    assert bool(jnp.array_equal(out5, weight[:, :seq, :]))

    print("KERNEL_OK")
</pallas_src>

<mosaic_0001>
module attributes {stable_mosaic.version = 11 : i64} {
  func.func @kernel(%arg0: memref<8x256xf32, #tpu.memory_space<any>>, %arg1: memref<1x256xf32, #tpu.memory_space<any>>, %arg2: memref<1x!tpu.dma_semaphore, #tpu.memory_space<semaphore_mem>>) attributes {dimension_semantics = [], scalar_prefetch = 0 : i64, scratch_operands = 1 : i64, tpu.core_type = #tpu.core_type<tc>} {
    %c0_i32 = arith.constant 0 : i32
    %c0_i32_0 = arith.constant 0 : i32
    %c0_i32_1 = arith.constant 0 : i32
    %0 = tpu.memref_slice %arg0[%c0_i32_0, %c0_i32_1] : memref<8x256xf32, #tpu.memory_space<any>> -> memref<1x256xf32, #tpu.memory_space<any>>
    %c0_i32_2 = arith.constant 0 : i32
    %c0_i32_3 = arith.constant 0 : i32
    %1 = tpu.memref_slice %arg1[%c0_i32_2, %c0_i32_3] : memref<1x256xf32, #tpu.memory_space<any>> -> memref<1x256xf32, #tpu.memory_space<any>>
    %2 = tpu.memref_slice %arg2[%c0_i32] : memref<1x!tpu.dma_semaphore, #tpu.memory_space<semaphore_mem>> -> memref<1x!tpu.dma_semaphore, #tpu.memory_space<semaphore_mem>>
    %3 = tpu.memref_squeeze %2 : memref<1x!tpu.dma_semaphore, #tpu.memory_space<semaphore_mem>> -> memref<!tpu.dma_semaphore, #tpu.memory_space<semaphore_mem>>
    tpu.enqueue_dma source(%0 : memref<1x256xf32, #tpu.memory_space<any>>) target(%1 : memref<1x256xf32, #tpu.memory_space<any>>) target_semaphore(%3 : memref<!tpu.dma_semaphore, #tpu.memory_space<semaphore_mem>>)
    %c0_i32_4 = arith.constant 0 : i32
    %c0_i32_5 = arith.constant 0 : i32
    %c0_i32_6 = arith.constant 0 : i32
    %4 = tpu.memref_slice %arg0[%c0_i32_5, %c0_i32_6] : memref<8x256xf32, #tpu.memory_space<any>> -> memref<1x256xf32, #tpu.memory_space<any>>
    %c0_i32_7 = arith.constant 0 : i32
    %c0_i32_8 = arith.constant 0 : i32
    %5 = tpu.memref_slice %arg1[%c0_i32_7, %c0_i32_8] : memref<1x256xf32, #tpu.memory_space<any>> -> memref<1x256xf32, #tpu.memory_space<any>>
    %6 = tpu.memref_slice %arg2[%c0_i32_4] : memref<1x!tpu.dma_semaphore, #tpu.memory_space<semaphore_mem>> -> memref<1x!tpu.dma_semaphore, #tpu.memory_space<semaphore_mem>>
    %7 = tpu.memref_squeeze %6 : memref<1x!tpu.dma_semaphore, #tpu.memory_space<semaphore_mem>> -> memref<!tpu.dma_semaphore, #tpu.memory_space<semaphore_mem>>
    tpu.wait_dma2 semaphore(%7 : memref<!tpu.dma_semaphore, #tpu.memory_space<semaphore_mem>>) src(%4 : memref<1x256xf32, #tpu.memory_space<any>>) dst(%5 : memref<1x256xf32, #tpu.memory_space<any>>)
    return
  }
}

</mosaic_0001>

<bundles_post_ra>
// kernel: learnable_positional_embedding.1
= control target key start
LH: loop header
LB: loop body
LE: loop exit
PB: predicated region body
PF: predicated region fallthrough
CT: control target
= control target key end

     0   :  { %s98_s0 = inlined_call_operand.vmem [shape: f32[8,256], index: 0, kind: input, shape index: {}]   ;;  %s99_s1 = inlined_call_operand.vmem [shape: f32[1,256], index: 1, kind: output, shape index: {}]  }
   0x1   :  { %v23_v0 = vld [vmem:[%s98_s0] sm:$0x1]  ;;  %v25_v1 = vld [vmem:[%s98_s0 + $0x8] sm:$0x1] }
   0x2   :  { %24 = vst [vmem:[%s99_s1] sm:$0x1] %v23_v0  ;;  %26 = vst [vmem:[%s99_s1 + $0x1] sm:$0x1] %v25_v1 }
   0x3   :  { %53 = vsyncadd [#allocation2], 32 }
   0x4   :  { %74 = dma.done.wait [#allocation2], 32 }
   0x5   :  { %75 = vsyncadd [#allocation2], 4294967264 }
   0x6   :  { %57 = vsyncmov [#allocation2] }
   0x9   :  { %s58_s14 = vpop.sfrf %57 }
   0xa   :  { %p73_p0 = scmp.ne.s32.totalorder %s58_s14, 0 }
   0xc   :  { %62 = shalt.err (%p73_p0)  }

</bundles_post_ra>
